<compile_context>
chip_gen: v7x
topology: tpu7x:2x2x1
jax: 0.10.0
libtpu: 0.0.40
codegen_flags: <defaults>
</compile_context>

<pallas_src>
import functools

import jax
import jax.numpy as jnp
from jax import lax
from jax.experimental import pallas as pl
from jax.experimental.pallas import tpu as pltpu

_NEG_PAD = -1e30  # bias for padded logit lanes -> exp() underflows to 0


def _round_up(x, m):
    return ((x + m - 1) // m) * m


def _pad_lanes(a, width):
    return jnp.pad(a, ((0, 0), (0, width - a.shape[1])))


# ----------------------------------------------------------------------------
# Parameter packing (done once, outside the per-step path)
# ----------------------------------------------------------------------------
def prepare_params(w_i2h, b_i2h, w_i2o, b_i2o, input_size, lane=128,
                   weight_dtype=jnp.bfloat16):
    """Pack PyTorch-convention weights into two fused, lane-padded matrices.

    w_i2h: [H, I+H], b_i2h: [H]   (nn.Linear(input+hidden, hidden))
    w_i2o: [O, I+H], b_i2o: [O]   (nn.Linear(input+hidden, output))

    Returns ((wx_all [I, Hp+Op] bf16, wh_all [Hp, Hp+Op] bf16, b_all [1, Hp+Op] f32), dims).
    Column layout: [0:H) hidden head, [Hp:Hp+O) output head, rest zero-padding.
    split-weight identity: cat([x,h]) @ W^T == x @ Wx^T + h @ Wh^T (exact).
    """
    hidden_size, tot = w_i2h.shape
    output_size = w_i2o.shape[0]
    assert tot == input_size + hidden_size
    hp = _round_up(hidden_size, lane)
    op = _round_up(output_size, lane)
    n_p = hp + op

    wxh_t = w_i2h[:, :input_size].T      # [I, H]
    whh_t = w_i2h[:, input_size:].T      # [H, H]
    wxo_t = w_i2o[:, :input_size].T      # [I, O]
    who_t = w_i2o[:, input_size:].T      # [H, O]

    wx = jnp.zeros((input_size, n_p), jnp.float32)
    wx = wx.at[:, :hidden_size].set(wxh_t)
    wx = wx.at[:, hp:hp + output_size].set(wxo_t)

    wh = jnp.zeros((hp, n_p), jnp.float32)
    wh = wh.at[:hidden_size, :hidden_size].set(whh_t)
    wh = wh.at[:hidden_size, hp:hp + output_size].set(who_t)

    b = jnp.zeros((1, n_p), jnp.float32)
    b = b.at[0, :hidden_size].set(b_i2h)
    b = b.at[0, hp:hp + output_size].set(b_i2o)
    b = b.at[0, hp + output_size:].set(_NEG_PAD)

    dims = dict(input_size=input_size, hidden_size=hidden_size,
                output_size=output_size, hp=hp, op=op)
    return (wx.astype(weight_dtype), wh.astype(weight_dtype), b), dims


def pad_hidden(h, dims):
    """Pad hidden state [B, H] -> [B, Hp] once; keep it padded across decode steps."""
    return _pad_lanes(h, dims["hp"])


# ----------------------------------------------------------------------------
# Single-step kernel (decode path; mirrors RNN.forward exactly)
# ----------------------------------------------------------------------------
def rnn_cell_kernel(x_ref, h_ref, wx_ref, wh_ref, b_ref, out_ref, hid_ref, *, hp):
    x = x_ref[...].astype(wx_ref.dtype)              # [B, I]  -> bf16 for MXU
    h = h_ref[...].astype(wh_ref.dtype)              # [B, Hp] (zero-padded) -> bf16

    # Two fused MXU passes: both heads share one output slab, f32 accumulation.
    res = (jnp.dot(x, wx_ref[...], preferred_element_type=jnp.float32)
           + jnp.dot(h, wh_ref[...], preferred_element_type=jnp.float32)
           + b_ref[...])                             # [B, Hp+Op] f32

    hid_ref[...] = res[:, :hp].astype(hid_ref.dtype)

    logits = res[:, hp:]                             # [B, Op] (pad lanes ~ -1e30)
    m = jnp.max(logits, axis=-1, keepdims=True)
    shifted = logits - m
    lse = jnp.log(jnp.sum(jnp.exp(shifted), axis=-1, keepdims=True))
    out_ref[...] = (shifted - lse).astype(out_ref.dtype)


def rnn_step(params, x, h_pad, *, dims):
    """One padded-state RNN step: (out_pad [B,Op], h_pad_new [B,Hp]).

    Hidden stays lane-padded across calls (pad once via pad_hidden()); slice out_pad[:, :O]
    only where consumed.
    # TODO(synk): for production decode keep weights persistent across calls (cross-call
    # VMEM future / input_output_aliases) instead of re-DMA'ing them every step.
    """
    wx, wh, b = params
    B, I = x.shape
    hp, op = dims["hp"], dims["op"]
    n_p = hp + op

    vmem = pl.BlockSpec(memory_space=pltpu.MemorySpace.VMEM)
    cost = pl.CostEstimate(
        flops=int(2 * B * (I + hp) * n_p),
        transcendentals=int(B * op),
        bytes_accessed=int((wx.size + wh.size) * wx.dtype.itemsize
                           + 4 * (b.size + x.size + h_pad.size + 2 * B * n_p)),
    )
    return pl.pallas_call(
        functools.partial(rnn_cell_kernel, hp=hp),
        out_shape=(jax.ShapeDtypeStruct((B, op), x.dtype),
                   jax.ShapeDtypeStruct((B, hp), x.dtype)),
        in_specs=[vmem] * 5,
        out_specs=(vmem, vmem),
        cost_estimate=cost,
    )(x, h_pad, wx, wh, b)


def rnn_forward(params, x, h, *, dims):
    """Exactly matches RNN.forward(input, hidden) -> (log_softmax output [B,O], hidden [B,H])."""
    out_p, hid_p = rnn_step(params, x, pad_hidden(h, dims), dims=dims)
    return out_p[:, :dims["output_size"]], hid_p[:, :dims["hidden_size"]]


# ----------------------------------------------------------------------------
# Whole-sequence kernel: only the recurrent matmul stays inside the serial loop.
# ----------------------------------------------------------------------------
def rnn_seq_kernel(xproj_ref, h0_ref, wh_ref, out_ref, hlast_ref, h_scr, *, hp, u):
    step = pl.program_id(0)

    @pl.when(step == 0)
    def _():
        # Carried hidden state lives in f32 scratch for the whole sequence.
        h_scr[...] = h0_ref[...].astype(jnp.float32)

    def body(i, carry):
        h = h_scr[...]                                           # [B, Hp] f32
        # Only the h-matmul is on the recurrence dependence chain (bf16 in, f32 acc).
        res = (jnp.dot(h.astype(wh_ref.dtype), wh_ref[...],
                       preferred_element_type=jnp.float32)
               + xproj_ref[i])                                   # [B, Hp+Op] f32
        h_scr[...] = res[:, :hp]
        logits = res[:, hp:]
        m = jnp.max(logits, axis=-1, keepdims=True)
        shifted = logits - m
        lse = jnp.log(jnp.sum(jnp.exp(shifted), axis=-1, keepdims=True))
        out_ref[i] = (shifted - lse).astype(out_ref.dtype)
        return carry

    # U timesteps per grid step; unrolled so the LLO scheduler sees the whole block.
    lax.fori_loop(0, u, body, 0, unroll=True)

    @pl.when(step == pl.num_programs(0) - 1)
    def _():
        hlast_ref[...] = h_scr[...].astype(hlast_ref.dtype)


def rnn_sequence(params, x_seq, h0, *, dims, unroll=8):
    """Apply the RNN cell over x_seq[t], t=0..T-1 (== Python loop of rnn_forward).

    Returns (out_seq [T,B,O], h_final [B,H]).
    """
    wx, wh, b = params
    T, B, I = x_seq.shape
    H, O = dims["hidden_size"], dims["output_size"]
    hp, op = dims["hp"], dims["op"]
    n_p = hp + op

    # Timesteps per grid step: largest divisor of T not exceeding `unroll`.
    u = max(d for d in range(1, min(unroll, T) + 1) if T % d == 0)

    h0_pad = _pad_lanes(h0, hp)

    # ---- Input projection hoisted off the recurrence: one big MXU matmul + bias fold. ----
    xproj = (jnp.dot(x_seq.reshape(T * B, I).astype(wx.dtype), wx,
                     preferred_element_type=jnp.float32)
             .reshape(T, B, n_p) + b)                 # [T, B, Hp+Op] f32 (lane-dense)

    # VMEM budget: resident wh/h0/scratch/hlast + double-buffered streamed xproj/out.
    est = (wh.size * wh.dtype.itemsize
           + 3 * B * hp * 4
           + 2 * u * B * n_p * 4
           + 2 * u * B * op * 4)
    vmem_limit = int(max(32 * 1024 * 1024, 2 * est))

    cost = pl.CostEstimate(
        flops=int(2 * B * hp * n_p * T),              # recurrent matmul only (xproj is XLA)
        transcendentals=int(B * op * T),
        bytes_accessed=int(wh.size * wh.dtype.itemsize
                           + 4 * (xproj.size + B * hp * 2 + T * B * op)),
    )

    out_seq_p, h_last_p = pl.pallas_call(
        functools.partial(rnn_seq_kernel, hp=hp, u=u),
        out_shape=(jax.ShapeDtypeStruct((T, B, op), x_seq.dtype),
                   jax.ShapeDtypeStruct((B, hp), x_seq.dtype)),
        grid_spec=pltpu.PrefetchScalarGridSpec(
            num_scalar_prefetch=0,
            grid=(T // u,),
            in_specs=[
                pl.BlockSpec((u, B, n_p), lambda s: (s, 0, 0)),  # xproj streamed, lane-dense
                pl.BlockSpec((B, hp), lambda s: (0, 0)),         # h0 resident (DMA'd once)
                pl.BlockSpec((hp, n_p), lambda s: (0, 0)),       # bf16 recurrent weights resident
            ],
            out_specs=(
                pl.BlockSpec((u, B, op), lambda s: (s, 0, 0)),   # out streamed
                pl.BlockSpec((B, hp), lambda s: (0, 0)),         # final hidden, one writeback
            ),
            scratch_shapes=[pltpu.VMEM((B, hp), jnp.float32)],   # carried hidden (f32)
        ),
        compiler_params=pltpu.CompilerParams(
            dimension_semantics=("arbitrary",),                  # T carries the recurrence
            vmem_limit_bytes=vmem_limit),
        cost_estimate=cost,
    )(xproj, h0_pad, wh)
    # For v7x: add a leading "parallel" batch grid axis to use the 2nd TensorCore.
    return out_seq_p[:, :, :O], h_last_p[:, :H]


# ----------------------------------------------------------------------------
# Demo / correctness check
# ----------------------------------------------------------------------------
def _init_linear(key, out_features, in_features):
    # Mimic torch.nn.Linear default init: U(-1/sqrt(fan_in), +1/sqrt(fan_in)).
    kw, kb = jax.random.split(key)
    bound = 1.0 / jnp.sqrt(jnp.float32(in_features))
    w = jax.random.uniform(kw, (out_features, in_features), jnp.float32, -bound, bound)
    bb = jax.random.uniform(kb, (out_features,), jnp.float32, -bound, bound)
    return w, bb


if __name__ == "__main__":
    input_size, hidden_size, output_size = 16, 32, 8
    batch, seq_len = 8, 12   # small demo; use batch >= 128 for real MXU utilization

    key = jax.random.PRNGKey(0)
    k_x, k_xs, k_h, k_i2h, k_i2o = jax.random.split(key, 5)

    x = jax.random.normal(k_x, (batch, input_size), jnp.float32)
    x_seq = jax.random.normal(k_xs, (seq_len, batch, input_size), jnp.float32)
    h0 = jax.random.normal(k_h, (batch, hidden_size), jnp.float32)

    w_i2h, b_i2h = _init_linear(k_i2h, hidden_size, input_size + hidden_size)
    w_i2o, b_i2o = _init_linear(k_i2o, output_size, input_size + hidden_size)

    # Weight split / transpose / pack / bf16 cast hoisted out of the per-step path.
    params, dims = prepare_params(w_i2h, b_i2h, w_i2o, b_i2o, input_size)

    step_fn = jax.jit(functools.partial(rnn_forward, dims=dims))
    seq_fn = jax.jit(functools.partial(rnn_sequence, dims=dims))

    out, hid = step_fn(params, x, h0)
    out_seq, h_last = seq_fn(params, x_seq, h0)
    jax.block_until_ready((out, hid, out_seq, h_last))

    H, O, hp = hidden_size, output_size, dims["hp"]

    # ---- Quantization-aware reference (same bf16 weights & operand casts, f32 accumulate;
    #      mirrors the kernel math exactly -> tight tolerance). ----
    wx_q, wh_q, b_q = params
    wx32 = wx_q.astype(jnp.float32)
    wh32 = wh_q.astype(jnp.float32)

    def ref_step_q(xt, ht_pad):
        xb = xt.astype(jnp.bfloat16).astype(jnp.float32)
        hb = ht_pad.astype(jnp.bfloat16).astype(jnp.float32)
        res = xb @ wx32 + hb @ wh32 + b_q
        return jax.nn.log_softmax(res[:, hp:], axis=-1), res[:, :hp]

    h0_pad = pad_hidden(h0, dims)
    out_r, hid_r = ref_step_q(x, h0_pad)
    assert jnp.allclose(out, out_r[:, :O], atol=2e-3), "single-step output mismatch"
    assert jnp.allclose(hid, hid_r[:, :H], atol=2e-3), "single-step hidden mismatch"

    h_r = h0_pad
    outs_r = []
    for t in range(seq_len):
        o_r, h_r = ref_step_q(x_seq[t], h_r)
        outs_r.append(o_r[:, :O])
    out_seq_r = jnp.stack(outs_r, axis=0)
    assert jnp.allclose(out_seq, out_seq_r, atol=2e-3), "sequence output mismatch"
    assert jnp.allclose(h_last, h_r[:, :H], atol=2e-3), "sequence final hidden mismatch"

    # ---- Exact f32 module semantics (loose tolerance covers bf16 weight quantization). ----
    def ref_step_exact(xt, ht):
        combined = jnp.concatenate([xt, ht], axis=1)
        return (jax.nn.log_softmax(combined @ w_i2o.T + b_i2o, axis=-1),
                combined @ w_i2h.T + b_i2h)

    out_e, hid_e = ref_step_exact(x, h0)
    assert jnp.allclose(out, out_e, atol=1e-1), "module-semantics output drift"
    assert jnp.allclose(hid, hid_e, atol=1e-1), "module-semantics hidden drift"

    print("KERNEL_OK")
</pallas_src>

<mosaic_0001>
module attributes {stable_mosaic.version = 11 : i64} {
  func.func @rnn_cell_kernel(%arg0: memref<8x16xf32, #tpu.memory_space<vmem>>, %arg1: memref<8x128xf32, #tpu.memory_space<vmem>>, %arg2: memref<16x256xbf16, #tpu.memory_space<vmem>>, %arg3: memref<128x256xbf16, #tpu.memory_space<vmem>>, %arg4: memref<1x256xf32, #tpu.memory_space<vmem>>, %arg5: memref<8x128xf32, #tpu.memory_space<vmem>>, %arg6: memref<8x128xf32, #tpu.memory_space<vmem>>) attributes {dimension_semantics = [], scalar_prefetch = 0 : i64, scratch_operands = 0 : i64, tpu.core_type = #tpu.core_type<tc>} {
    %c0 = arith.constant 0 : index
    %c0_0 = arith.constant 0 : index
    %0 = vector.load %arg0[%c0, %c0_0] : memref<8x16xf32, #tpu.memory_space<vmem>>, vector<8x16xf32>
    %1 = arith.truncf %0 : vector<8x16xf32> to vector<8x16xbf16>
    %c0_1 = arith.constant 0 : index
    %c0_2 = arith.constant 0 : index
    %2 = vector.load %arg1[%c0_1, %c0_2] : memref<8x128xf32, #tpu.memory_space<vmem>>, vector<8x128xf32>
    %3 = arith.truncf %2 : vector<8x128xf32> to vector<8x128xbf16>
    %c0_3 = arith.constant 0 : index
    %c0_4 = arith.constant 0 : index
    %4 = vector.load %arg2[%c0_3, %c0_4] : memref<16x256xbf16, #tpu.memory_space<vmem>>, vector<16x256xbf16>
    %cst = arith.constant dense<0.000000e+00> : vector<8x256xf32>
    %5 = tpu.matmul %1, %4, %cst {dimension_numbers = #tpu.dot_dimension_numbers<[1], [0], [0], [1], [0, 0, 1, 1], [], []>} : vector<8x16xbf16>, vector<16x256xbf16>, vector<8x256xf32> -> vector<8x256xf32>
    %c0_5 = arith.constant 0 : index
    %c0_6 = arith.constant 0 : index
    %6 = vector.load %arg3[%c0_5, %c0_6] : memref<128x256xbf16, #tpu.memory_space<vmem>>, vector<128x256xbf16>
    %cst_7 = arith.constant dense<0.000000e+00> : vector<8x256xf32>
    %7 = tpu.matmul %3, %6, %cst_7 {dimension_numbers = #tpu.dot_dimension_numbers<[1], [0], [0], [1], [0, 0, 1, 1], [], []>} : vector<8x128xbf16>, vector<128x256xbf16>, vector<8x256xf32> -> vector<8x256xf32>
    %8 = arith.addf %5, %7 : vector<8x256xf32>
    %c0_8 = arith.constant 0 : index
    %c0_9 = arith.constant 0 : index
    %9 = vector.load %arg4[%c0_8, %c0_9] : memref<1x256xf32, #tpu.memory_space<vmem>>, vector<1x256xf32>
    %10 = vector.broadcast %9 : vector<1x256xf32> to vector<8x256xf32>
    %11 = arith.addf %8, %10 : vector<8x256xf32>
    %12 = vector.extract_strided_slice %11 {offsets = [0, 0], sizes = [8, 128], strides = [1, 1]} : vector<8x256xf32> to vector<8x128xf32>
    %c0_10 = arith.constant 0 : index
    %c0_11 = arith.constant 0 : index
    %13 = vector.load %arg6[%c0_10, %c0_11] : memref<8x128xf32, #tpu.memory_space<vmem>>, vector<8x128xf32>
    tpu.vector_store %arg6[%c0_10, %c0_11], %12 {strides = array<i32>} : memref<8x128xf32, #tpu.memory_space<vmem>>, vector<8x128xf32>,
    %14 = vector.extract_strided_slice %11 {offsets = [0, 128], sizes = [8, 128], strides = [1, 1]} : vector<8x256xf32> to vector<8x128xf32>
    %cst_12 = arith.constant dense<0xFF800000> : vector<8xf32>
    %15 = vector.multi_reduction <maximumf>, %14, %cst_12 [1] : vector<8x128xf32> to vector<8xf32>
    %16 = vector.shape_cast %15 : vector<8xf32> to vector<8x1xf32>
    %17 = vector.broadcast %16 : vector<8x1xf32> to vector<8x128xf32>
    %18 = arith.subf %14, %17 : vector<8x128xf32>
    %19 = math.exp %18 : vector<8x128xf32>
    %cst_13 = arith.constant dense<0.000000e+00> : vector<8xf32>
    %20 = vector.multi_reduction <add>, %19, %cst_13 [1] : vector<8x128xf32> to vector<8xf32>
    %21 = vector.shape_cast %20 : vector<8xf32> to vector<8x1xf32>
    %22 = math.log %21 : vector<8x1xf32>
    %23 = vector.broadcast %22 : vector<8x1xf32> to vector<8x128xf32>
    %24 = arith.subf %18, %23 : vector<8x128xf32>
    %c0_14 = arith.constant 0 : index
    %c0_15 = arith.constant 0 : index
    %25 = vector.load %arg5[%c0_14, %c0_15] : memref<8x128xf32, #tpu.memory_space<vmem>>, vector<8x128xf32>
    tpu.vector_store %arg5[%c0_14, %c0_15], %24 {strides = array<i32>} : memref<8x128xf32, #tpu.memory_space<vmem>>, vector<8x128xf32>,
    return
  }
}

</mosaic_0001>

<bundles_post_ra>
// kernel: rnn_forward.1
= control target key start
LH: loop header
LB: loop body
LE: loop exit
PB: predicated region body
PF: predicated region fallthrough
CT: control target
= control target key end

     0   :  { %12 = vsyncpa [#allocation3], 0  ;;  %s560_s0 = inlined_call_operand.vmem [shape: f32[8,16], index: 0, kind: input, shape index: {}]   ;;  %s561_s1 = inlined_call_operand.vmem [shape: f32[8,128], index: 1, kind: input, shape index: {}]   ;;  %s562_s2 = inlined_call_operand.vmem [shape: bf16[16,256], index: 2, kind: input, shape index: {}]   ;;  %s563_s3 = inlined_call_operand.hbm [shape: bf16[128,256], index: 3, kind: input, shape index: {}]   ;;  %s564_s4 = inlined_call_operand.hbm [shape: f32[1,256], index: 4, kind: input, shape index: {}]   ;;  %s565_s5 = inlined_call_operand.hbm [shape: f32[8,128], index: 5, kind: output, shape index: {0}]   ;;  %s566_s6 = inlined_call_operand.hbm [shape: f32[8,128], index: 6, kind: output, shape index: {1}]  }
   0x1   :  { %13 = vsyncpa [#allocation6], 0 }
   0x2   :  { %14 = vsyncpa [#allocation4], 0 }
   0x3   :  { %15 = vsyncpa [#allocation9], 0  ;;  %s458_s21 = smov [#allocation2]   ;;  %s362_s25 = scalar_lea.hbm %s563_s3, 2048 }
   0x4   :  { %s27_s22 = sshll.u32 %s458_s21, 4  ;;  %p363_p0 = scmp.ne.s32.totalorder %s563_s3, %s362_s25  ;;  %s28_s22 = int_to_ptr.vmem [resolvable:$true] %s27_s22 }
   0x5   :  { %p366_p1 = scmp.lt.u32.totalorder %s362_s25, %s563_s3 }
   0x7   :  { %p368_p2 = pnand %p366_p1, %p363_p0 }
   0x9   :  { %371 = shalt.err (!%p368_p2)
}
   0xa   :  { %s372_s30 = scalar_lea.vmem %s28_s22, 2048  ;;  %p377_p4 = scmp.lt.s32.totalorder %s28_s22, %s28_s22 }
   0xb   :  { %p373_p3 = scmp.ne.s32.totalorder %s28_s22, %s372_s30  ;;  %p378_p5 = scmp.lt.s32.totalorder %s372_s30, %s372_s30 }
   0xd   :  { %p379_p6 = por %p378_p5, %p377_p4 }
   0xf   :  { %p380_p7 = pnand %p379_p6, %p373_p3 }
  0x11   :  { %383 = shalt.err (!%p380_p7)
}
  0x12   :  { %s459_s7 = smov 128   ;;  %s460_s8 = smov 8  }
  0x13   :  { %33 = dma.hbm_to_vmem [thread:$0]  %s563_s3, 2048, %s28_s22, [#allocation3], %s459_s7, %s459_s7, %s460_s8  }
  0x14   :  { %s461_s11 = smov [#allocation5]   ;;  %s384_s15 = scalar_lea.hbm %s564_s4, 32 }
  0x15   :  { %s40_s12 = sshll.u32 %s461_s11, 4  ;;  %p385_p8 = scmp.ne.s32.totalorder %s564_s4, %s384_s15  ;;  %s41_s12 = int_to_ptr.vmem [resolvable:$true] %s40_s12 }
  0x16   :  { %p388_p9 = scmp.lt.u32.totalorder %s384_s15, %s564_s4 }
  0x18   :  { %p390_p10 = pnand %p388_p9, %p385_p8 }
  0x1a   :  { %393 = shalt.err (!%p390_p10)
}
  0x1b   :  { %s394_s20 = scalar_lea.vmem %s41_s12, 32  ;;  %p399_p12 = scmp.lt.s32.totalorder %s41_s12, %s41_s12 }
  0x1c   :  { %p395_p11 = scmp.ne.s32.totalorder %s41_s12, %s394_s20  ;;  %p400_p13 = scmp.lt.s32.totalorder %s394_s20, %s394_s20 }
  0x1e   :  { %p401_p0 = por %p400_p13, %p399_p12 }
  0x20   :  { %p402_p1 = pnand %p401_p0, %p395_p11 }
  0x22   :  { %405 = shalt.err (!%p402_p1)
}
  0x23   :  { %43 = dma.hbm_to_vmem [thread:$0]  %s564_s4, 32, %s41_s12, [#allocation6]  }
  0x24   :  { %450 = dma.done.wait [#allocation3], 2048  }
  0x25   :  { %451 = vsyncadd [#allocation3], 4294965248 }
  0x26   :  { %452 = dma.done.wait [#allocation6], 32  }
  0x27   :  { %453 = vsyncadd [#allocation6], 4294967264  ;;  %v462_v0 = vmov 0   ;;  %v331_v1 = vld [vmem:[#allocation2 + $0x4] ss:$8 sps:$4 sm:$0xff]   ;;  %vm204_vm0 = vcmask 130048   ;;  %v251_v27 = vlaneseq }
  0x28   :  { %240 = vmatprep.mubr.bf16.mxu1 %v462_v0  ;;  %185 = vmatprep.mubr.bf16.mxu0 %v462_v0  ;;  %v333_v2 = vld [vmem:[#allocation2] ss:$8 sps:$4 sm:$0xff]   ;;  %v334_v3 = vld [vmem:[#allocation2 + $0x14] ss:$8 sps:$4 sm:$0xff]   ;;  %v336_v4 = vld [vmem:[#allocation2 + $0x10] ss:$8 sps:$4 sm:$0xff]  }
  0x29   :  { %153 = vmatprep.subr.bf16.mxu0 %v331_v1  ;;  %v337_v5 = vld [vmem:[#allocation2 + $0x24] ss:$8 sps:$4 sm:$0xff]   ;;  %v339_v6 = vld [vmem:[#allocation2 + $0x20] ss:$8 sps:$4 sm:$0xff]   ;;  %v340_v7 = vld [vmem:[#allocation2 + $0x34] ss:$8 sps:$4 sm:$0xff]  }
  0x2a   :  { %154 = vmatpush1.bf16.msra.mxu0 %v333_v2  ;;  %v352_v8 = vld [vmem:[%s562_s2 + $0x4] ss:$8 sps:$4 sm:$0xff]   ;;  %v354_v9 = vld [vmem:[%s562_s2] ss:$8 sps:$4 sm:$0xff]   ;;  %v342_v10 = vld [vmem:[#allocation2 + $0x30] ss:$8 sps:$4 sm:$0xff]  }
  0x2b   :  { %155 = vmatprep.subr.bf16.mxu0 %v334_v3  ;;  %v343_v11 = vld [vmem:[#allocation2 + $0x44] ss:$8 sps:$4 sm:$0xff]   ;;  %208 = vmatprep.subr.bf16.mxu1 %v352_v8  ;;  %v345_v14 = vld [vmem:[#allocation2 + $0x40] ss:$8 sps:$4 sm:$0xff]   ;;  %v346_v15 = vld [vmem:[#allocation2 + $0x54] ss:$8 sps:$4 sm:$0xff]  }
  0x2c   :  { %v51_v12 = vld [vmem:[%s560_s0] sm:$0xff]  ;;  %209 = vmatpush1.bf16.msra.mxu1 %v354_v9  ;;  %v348_v16 = vld [vmem:[#allocation2 + $0x50] ss:$8 sps:$4 sm:$0xff]   ;;  %v355_v19 = vld [vmem:[#allocation2 + $0x74] ss:$8 sps:$4 sm:$0xff]   ;;  %v252_v28 = vshrl.u32 %v251_v27, 7 }
  0x2d   :  { %v52_v13 = vpack.c.bf16 %v51_v12, %v51_v12  ;;  %v349_v17 = vld [vmem:[#allocation2 + $0x64] ss:$8 sps:$4 sm:$0xff]   ;;  %v351_v18 = vld [vmem:[#allocation2 + $0x60] ss:$8 sps:$4 sm:$0xff]   ;;  %v357_v20 = vld [vmem:[#allocation2 + $0x70] ss:$8 sps:$4 sm:$0xff]  }
  0x2e   :  { %156 = vmatpush1.bf16.msra.mxu0 %v336_v4  ;;  %v53_v21 = vld [vmem:[%s561_s1] sm:$0xff]  ;;  %v253_v29 = vsub.s32 0, %v252_v28  ;;  %v257_v31 = vsub.s32 1, %v252_v28  ;;  %s463_s1 = smov [#allocation8]  }
  0x2f   :  { %157 = vmatprep.subr.bf16.mxu0 %v337_v5  ;;  %323 = vmatmul.mubr.msk.bf16.vlgmr.msra.gmra.mrb[0].mxu1 %vm204_vm0, %v52_v13  ;;  %v54_v22 = vpack.c.bf16 %v53_v21, %v53_v21  ;;  %v249_v30 = vld [vmem:[#allocation5] sm:$0x3]  ;;  %s291_s27 = sshll.u32 %s463_s1, 4  ;;  %s292_s27 = int_to_ptr.vmem [resolvable:$true] %s291_s27 }
  0x30   :  { %v254_v32 = vrot.slane %v249_v30, %v253_v29  ;;  %v258_v34 = vrot.slane %v249_v30, %v257_v31  ;;  %s406_s28 = scalar_lea.vmem %s292_s27, 128  ;;  %p411_p3 = scmp.lt.s32.totalorder %s292_s27, %s292_s27 }
  0x31   :  { %p407_p2 = scmp.ne.s32.totalorder %s292_s27, %s406_s28  ;;  %p412_p4 = scmp.lt.s32.totalorder %s406_s28, %s406_s28 }
  0x32   :  { %158 = vmatpush1.bf16.msra.mxu0 %v339_v6 }
  0x33   :  { %159 = vmatprep.subr.bf16.mxu0 %v340_v7  ;;  %p413_p5 = por %p412_p4, %p411_p3 }
  0x35   :  { %p414_p6 = pnand %p413_p5, %p407_p2 }
  0x36   :  { %160 = vmatpush1.bf16.msra.mxu0 %v342_v10 }
  0x37   :  { %161 = vmatprep.subr.bf16.mxu0 %v343_v11 }
  0x3a   :  { %162 = vmatpush1.bf16.msra.mxu0 %v345_v14 }
  0x3b   :  { %163 = vmatprep.subr.bf16.mxu0 %v346_v15 }
  0x3e   :  { %164 = vmatpush1.bf16.msra.mxu0 %v348_v16 }
  0x3f   :  { %165 = vmatprep.subr.bf16.mxu0 %v349_v17 }
  0x42   :  { %166 = vmatpush1.bf16.msra.mxu0 %v351_v18 }
  0x43   :  { %167 = vmatprep.subr.bf16.mxu0 %v355_v19 }
  0x46   :  { %168 = vmatpush1.bf16.msra.mxu0 %v357_v20 }
  0x49   :  { %186 = vmatmul.mubr.bf16.vlgmr.msra.gmra.mrb[0].mxu0 %v54_v22 }
 0x102   :  { %v242_v23 = vpop.f32.mrb[0].mxu1 }
 0x103   :  { %v244_v24 = vpop.f32.mrb[1].mxu1 }
 0x104   :  { %v246_v25 = vpop.f32.mrb[2].mxu1 }
 0x105   :  { %v247_v26 = vpop.f32.mrb[3].mxu1 }
 0x11c   :  { %v187_v33 = vpop.f32.mrb[0].mxu0 }
 0x11d   :  { %v243_v35 = vadd.f32 %v242_v23, %v187_v33  ;;  %v189_v36 = vpop.f32.mrb[1].mxu0 }
 0x11e   :  { %v245_v37 = vadd.f32 %v244_v24, %v189_v36  ;;  %v191_v38 = vpop.f32.mrb[2].mxu0 }
 0x11f   :  { %v261_v39 = vadd.f32 %v254_v32, %v243_v35  ;;  %v192_v40 = vpop.f32.mrb[3].mxu0 }
 0x120   :  { %v262_v41 = vadd.f32 %v258_v34, %v245_v37 }
 0x121   :  { %263 = vst [vmem:[#allocation8] sm:$0xff] %v261_v39 }
 0x122   :  { %264 = vmax.xlane.f32.xlu0 %v262_v41 }
 0x1af   :  { %v265_v42 = vpop.xlane.xlu0 %264 }
 0x1b0   :  { %v266_v43 = vsub.f32 %v262_v41, %v265_v42 }
 0x1b2   :  { %v267_v44 = vmul.f32 1.442695, %v266_v43 }
 0x1b4   :  { %358 = vpow2.f32 %v267_v44 }
 0x1be   :  { %v359_v45 = vpop.eup %358 }
 0x1bf   :  { %269 = vadd.xlane.f32.xlu0 %v359_v45 }
 0x1c0   :  { %417 = shalt.err (!%p414_p6)
}
 0x1c1   :  { %s418_s7 = scalar_lea.hbm %s566_s6, 128 }
 0x1c2   :  { %p419_p7 = scmp.ne.s32.totalorder %s566_s6, %s418_s7  ;;  %p422_p8 = scmp.lt.u32.totalorder %s418_s7, %s566_s6 }
 0x1c4   :  { %p424_p9 = pnand %p422_p8, %p419_p7 }
 0x1c6   :  { %427 = shalt.err (!%p424_p9)
}
 0x1c7   :  { %294 = dma.vmem_to_hbm [thread:$0]  %s292_s27, 128, %s566_s6, [#allocation9]  }
 0x1c8   :  { %s464_s14 = smov [#allocation7]  }
 0x1c9   :  { %s281_s15 = sshll.u32 %s464_s14, 4  ;;  %s282_s15 = int_to_ptr.vmem [resolvable:$true] %s281_s15 }
 0x1ca   :  { %s428_s16 = scalar_lea.vmem %s282_s15, 128  ;;  %p433_p11 = scmp.lt.s32.totalorder %s282_s15, %s282_s15 }
 0x1cb   :  { %p429_p10 = scmp.ne.s32.totalorder %s282_s15, %s428_s16  ;;  %p434_p12 = scmp.lt.s32.totalorder %s428_s16, %s428_s16 }
 0x1cd   :  { %p435_p13 = por %p434_p12, %p433_p11 }
 0x1cf   :  { %p436_p0 = pnand %p435_p13, %p429_p10 }
 0x24c   :  { %v270_v46 = vpop.xlane.xlu0 %269 }
 0x24d   :  { %360 = vlog2.f32 %v270_v46 }
 0x257   :  { %v361_v47 = vpop.eup %360 }
 0x258   :  { %v272_v48 = vmul.f32 0.6931472, %v361_v47 }
 0x25a   :  { %v273_v49 = vsub.f32 %v266_v43, %v272_v48 }
 0x25c   :  { %274 = vst [vmem:[#allocation7] sm:$0xff] %v273_v49 }
 0x25d   :  { %439 = shalt.err (!%p436_p0)
}
 0x25e   :  { %s440_s6 = scalar_lea.hbm %s565_s5, 128 }
 0x25f   :  { %p441_p1 = scmp.ne.s32.totalorder %s565_s5, %s440_s6  ;;  %p444_p2 = scmp.lt.u32.totalorder %s440_s6, %s565_s5 }
 0x261   :  { %p446_p3 = pnand %p444_p2, %p441_p1 }
 0x263   :  { %449 = shalt.err (!%p446_p3)
}
 0x264   :  { %284 = dma.vmem_to_hbm [thread:$0]  %s282_s15, 128, %s565_s5, [#allocation4]  }
 0x265   :  { %454 = dma.done.wait [#allocation4], 128  }
 0x266   :  { %455 = vsyncadd [#allocation4], 4294967168 }
 0x267   :  { %456 = dma.done.wait [#allocation9], 128  }
 0x268   :  { %457 = vsyncadd [#allocation9], 4294967168 }
 0x269   :  { %301 = vsyncpa [#allocation3], 1 }
 0x26a   :  { %302 = vsyncpa [#allocation6], 1 }
 0x26b   :  { %303 = vsyncpa [#allocation4], 1 }
 0x26c   :  { %304 = vsyncpa [#allocation9], 1 }

</bundles_post_ra>
